<compile_context>
chip_gen: v6e
topology: v6e:2x2x1
jax: 0.10.0
libtpu: 0.0.40
codegen_flags: <defaults>
</compile_context>

<pallas_src>
import functools

import jax
import jax.numpy as jnp
from jax.experimental import pallas as pl
from jax.experimental.pallas import tpu as pltpu

LANE = 128      # vreg lane width (last dim)
SUBLANE = 8     # vreg sublane width (second-to-last dim)


def _round_up(x, m):
    return pl.cdiv(x, m) * m


def dqn_kernel(x_ref, w1_ref, w2_ref, w3_ref, o_ref):
    """3-layer MLP on one batch tile. Biases are pre-folded into the weights."""
    wdt = w1_ref.dtype
    # fc1 + relu (MXU matmul, f32 accumulation; ReLU kept in f32 for v5e VPU)
    h = jnp.dot(x_ref[...], w1_ref[...], preferred_element_type=jnp.float32)
    h = jnp.maximum(h, 0.0).astype(wdt)
    # fc2 + relu
    h = jnp.dot(h, w2_ref[...], preferred_element_type=jnp.float32)
    h = jnp.maximum(h, 0.0).astype(wdt)
    # fc3 (no activation); output block keeps its natural (small) lane width.
    o_ref[...] = jnp.dot(
        h, w3_ref[...], preferred_element_type=jnp.float32
    ).astype(o_ref.dtype)


def _pack_params(w1, b1, w2, b2, w3, b3, hid_p, param_dtype):
    """Fold biases via a ones lane; only the hidden dim is lane-padded (to 128)."""
    in_size, hidden = w1.shape
    out_size = w3.shape[1]

    # fc1: (in_size+1, hid_p). Bias row at [in_size]; 1.0 at [in_size, hidden]
    # propagates the ones lane into h1 (ReLU(1) == 1).
    w1p = jnp.zeros((in_size + 1, hid_p), jnp.float32)
    w1p = w1p.at[:in_size, :hidden].set(w1)
    w1p = w1p.at[in_size, :hidden].set(b1)
    w1p = w1p.at[in_size, hidden].set(1.0)

    # fc2: (hid_p, hid_p). Bias row at [hidden]; 1.0 keeps the ones lane alive.
    w2p = jnp.zeros((hid_p, hid_p), jnp.float32)
    w2p = w2p.at[:hidden, :hidden].set(w2)
    w2p = w2p.at[hidden, :hidden].set(b2)
    w2p = w2p.at[hidden, hidden].set(1.0)

    # fc3: (hid_p, out_size) -- no output-lane padding.
    w3p = jnp.zeros((hid_p, out_size), jnp.float32)
    w3p = w3p.at[:hidden, :].set(w3)
    w3p = w3p.at[hidden, :].set(b3)

    return (w1p.astype(param_dtype), w2p.astype(param_dtype), w3p.astype(param_dtype))


@functools.partial(jax.jit, static_argnames=("block_b", "param_dtype"))
def dqn_forward(x, w1, b1, w2, b2, w3, b3, *, block_b=1024, param_dtype=jnp.float32):
    """x: (B, input_size) f32. Weights are (in, out) so y = x @ W + b
    (equivalent to PyTorch's x @ W.T + b). Returns (B, output_size) f32.

    param_dtype=jnp.bfloat16 halves HBM traffic on v6e/v7x (f32 accumulation is
    kept) at a precision cost; default f32 matches the reference to ~1e-6.
    """
    B, in_size = x.shape
    hidden = w1.shape[1]
    out_size = w3.shape[1]

    in_p = in_size + 1                       # +1 ones lane (bias folding), no lane pad
    hid_p = _round_up(hidden + 1, LANE)      # hidden stays lane-dense for the MXU/VPU
    assert hid_p > hidden

    # Batch tiling: multiple of 8, capped at block_b, and split in two when the
    # batch is big enough so v7x's 2 TensorCores both get work.
    b_ceil = _round_up(B, SUBLANE)
    blk_b = min(block_b, b_ceil)
    if b_ceil > SUBLANE:
        blk_b = min(blk_b, _round_up(pl.cdiv(b_ceil, 2), SUBLANE))
    blk_b = _round_up(max(blk_b, 1), SUBLANE)
    B_pad = _round_up(B, blk_b)

    # Single-pass input prep: append the ones lane, pad the batch if needed.
    xd = x.astype(param_dtype)
    xb = jnp.concatenate([xd, jnp.ones((B, 1), param_dtype)], axis=1)  # (B, in_p)
    if B_pad != B:
        xb = jnp.pad(xb, ((0, B_pad - B), (0, 0)))

    w1p, w2p, w3p = _pack_params(w1, b1, w2, b2, w3, b3, hid_p, param_dtype)

    # Scheduling hint from the *real* problem size (not the padded one).
    bpe = jnp.dtype(param_dtype).itemsize
    flops = 2 * B * (in_size * hidden + hidden * hidden + hidden * out_size)
    bytes_accessed = (
        bpe * (B * in_size + in_size * hidden + hidden * hidden + hidden * out_size)
        + 4 * B * out_size
    )

    out = pl.pallas_call(
        dqn_kernel,
        out_shape=jax.ShapeDtypeStruct((B_pad, out_size), jnp.float32),
        grid=(B_pad // blk_b,),
        in_specs=[
            # Activations: one batch tile per grid step; last dim = full array dim.
            pl.BlockSpec((blk_b, in_p), lambda i: (i, 0)),
            # Weights: constant blocks -> DMA'd once, VMEM-resident across tiles.
            pl.BlockSpec((in_p, hid_p), lambda i: (0, 0)),
            pl.BlockSpec((hid_p, hid_p), lambda i: (0, 0)),
            pl.BlockSpec((hid_p, out_size), lambda i: (0, 0)),
        ],
        out_specs=pl.BlockSpec((blk_b, out_size), lambda i: (i, 0)),
        compiler_params=pltpu.CompilerParams(
            dimension_semantics=("parallel",),   # shard batch tiles across TCs on v7x
        ),
        cost_estimate=pl.CostEstimate(
            flops=flops, transcendentals=0, bytes_accessed=bytes_accessed
        ),
    )(xb, w1p, w2p, w3p)

    return out[:B] if B_pad != B else out


def init_params(key, input_size, output_size, hidden_size=64):
    """Deterministic synthetic parameters (shapes match nn.Linear of DQN)."""
    ks = jax.random.split(key, 6)
    s1 = 1.0 / jnp.sqrt(input_size)
    s2 = 1.0 / jnp.sqrt(hidden_size)
    w1 = jax.random.uniform(ks[0], (input_size, hidden_size), jnp.float32, -s1, s1)
    b1 = jax.random.uniform(ks[1], (hidden_size,), jnp.float32, -s1, s1)
    w2 = jax.random.uniform(ks[2], (hidden_size, hidden_size), jnp.float32, -s2, s2)
    b2 = jax.random.uniform(ks[3], (hidden_size,), jnp.float32, -s2, s2)
    w3 = jax.random.uniform(ks[4], (hidden_size, output_size), jnp.float32, -s2, s2)
    b3 = jax.random.uniform(ks[5], (output_size,), jnp.float32, -s2, s2)
    return w1, b1, w2, b2, w3, b3


def _reference(x, w1, b1, w2, b2, w3, b3):
    h = jnp.maximum(x @ w1 + b1, 0.0)
    h = jnp.maximum(h @ w2 + b2, 0.0)
    return h @ w3 + b3


if __name__ == "__main__":
    key = jax.random.PRNGKey(0)
    input_size, hidden_size, output_size = 16, 64, 8
    k_x, k_p, k_x2 = jax.random.split(key, 3)
    params = init_params(k_p, input_size, output_size, hidden_size)

    # Small single-tile case (tiny shapes).
    batch = 8
    x = jax.random.normal(k_x, (batch, input_size), jnp.float32)
    out = jax.block_until_ready(dqn_forward(x, *params))
    ref = _reference(x, *params)
    assert out.shape == (batch, output_size)
    assert jnp.allclose(out, ref, atol=1e-5, rtol=1e-5)

    # Multi-tile case: exercises the parallel batch grid (2 tiles, padded batch).
    batch2 = 260
    x2 = jax.random.normal(k_x2, (batch2, input_size), jnp.float32)
    out2 = jax.block_until_ready(dqn_forward(x2, *params))
    ref2 = _reference(x2, *params)
    assert out2.shape == (batch2, output_size)
    assert jnp.allclose(out2, ref2, atol=1e-5, rtol=1e-5)

    # bf16 weights/activations (v6e/v7x bandwidth option): f32 accumulation,
    # looser tolerance is the expected precision trade-off.
    out_bf16 = jax.block_until_ready(dqn_forward(x2, *params, param_dtype=jnp.bfloat16))
    assert out_bf16.shape == (batch2, output_size)
    assert jnp.allclose(out_bf16, ref2, atol=1e-1, rtol=1e-1)

    print("KERNEL_OK")
</pallas_src>

<mosaic_0001>
module attributes {stable_mosaic.version = 11 : i64} {
  func.func @dqn_kernel(%arg0: i32, %arg1: memref<8x17xf32, #tpu.memory_space<vmem>>, %arg2: memref<17x128xf32, #tpu.memory_space<vmem>>, %arg3: memref<128x128xf32, #tpu.memory_space<vmem>>, %arg4: memref<128x8xf32, #tpu.memory_space<vmem>>, %arg5: memref<8x8xf32, #tpu.memory_space<vmem>>) attributes {dimension_semantics = [#tpu.dimension_semantics<parallel>], iteration_bounds = array<i64: 1>, scalar_prefetch = 0 : i64, scratch_operands = 0 : i64, tpu.core_type = #tpu.core_type<tc>, window_params = [{transform_indices = @transform_0, window_bounds = array<i64: 8, 17>}, {pipeline_mode = #tpu.pipeline_mode<synchronous>, transform_indices = @transform_1, window_bounds = array<i64: 17, 128>}, {pipeline_mode = #tpu.pipeline_mode<synchronous>, transform_indices = @transform_2, window_bounds = array<i64: 128, 128>}, {pipeline_mode = #tpu.pipeline_mode<synchronous>, transform_indices = @transform_3, window_bounds = array<i64: 128, 8>}, {transform_indices = @transform_4, window_bounds = array<i64: 8, 8>}]} {
    %c0 = arith.constant 0 : index
    %c0_0 = arith.constant 0 : index
    %0 = vector.load %arg1[%c0, %c0_0] : memref<8x17xf32, #tpu.memory_space<vmem>>, vector<8x17xf32>
    %c0_1 = arith.constant 0 : index
    %c0_2 = arith.constant 0 : index
    %1 = vector.load %arg2[%c0_1, %c0_2] : memref<17x128xf32, #tpu.memory_space<vmem>>, vector<17x128xf32>
    %cst = arith.constant dense<0.000000e+00> : vector<8x128xf32>
    %2 = tpu.matmul %0, %1, %cst {dimension_numbers = #tpu.dot_dimension_numbers<[1], [0], [0], [1], [0, 0, 1, 1], [], []>} : vector<8x17xf32>, vector<17x128xf32>, vector<8x128xf32> -> vector<8x128xf32>
    %cst_3 = arith.constant 0.000000e+00 : f32
    %3 = vector.broadcast %cst_3 : f32 to vector<8x128xf32>
    %4 = arith.maximumf %2, %3 : vector<8x128xf32>
    %c0_4 = arith.constant 0 : index
    %c0_5 = arith.constant 0 : index
    %5 = vector.load %arg3[%c0_4, %c0_5] : memref<128x128xf32, #tpu.memory_space<vmem>>, vector<128x128xf32>
    %cst_6 = arith.constant dense<0.000000e+00> : vector<8x128xf32>
    %6 = tpu.matmul %4, %5, %cst_6 {dimension_numbers = #tpu.dot_dimension_numbers<[1], [0], [0], [1], [0, 0, 1, 1], [], []>} : vector<8x128xf32>, vector<128x128xf32>, vector<8x128xf32> -> vector<8x128xf32>
    %cst_7 = arith.constant 0.000000e+00 : f32
    %7 = vector.broadcast %cst_7 : f32 to vector<8x128xf32>
    %8 = arith.maximumf %6, %7 : vector<8x128xf32>
    %c0_8 = arith.constant 0 : index
    %c0_9 = arith.constant 0 : index
    %9 = vector.load %arg4[%c0_8, %c0_9] : memref<128x8xf32, #tpu.memory_space<vmem>>, vector<128x8xf32>
    %cst_10 = arith.constant dense<0.000000e+00> : vector<8x8xf32>
    %10 = tpu.matmul %8, %9, %cst_10 {dimension_numbers = #tpu.dot_dimension_numbers<[1], [0], [0], [1], [0, 0, 1, 1], [], []>} : vector<8x128xf32>, vector<128x8xf32>, vector<8x8xf32> -> vector<8x8xf32>
    %c0_11 = arith.constant 0 : index
    %c0_12 = arith.constant 0 : index
    %11 = vector.load %arg5[%c0_11, %c0_12] : memref<8x8xf32, #tpu.memory_space<vmem>>, vector<8x8xf32>
    tpu.vector_store %arg5[%c0_11, %c0_12], %10 {strides = array<i32>} : memref<8x8xf32, #tpu.memory_space<vmem>>, vector<8x8xf32>,
    return
  }
  func.func @transform_0(%arg0: i32) -> (i32, i32) {
    %c0_i32 = arith.constant 0 : i32
    %c0_i32_0 = arith.constant 0 : i32
    return %arg0, %c0_i32 : i32, i32
  }
  func.func @transform_1(%arg0: i32) -> (i32, i32) {
    %c0_i32 = arith.constant 0 : i32
    %c0_i32_0 = arith.constant 0 : i32
    %c0_i32_1 = arith.constant 0 : i32
    return %c0_i32, %c0_i32_0 : i32, i32
  }
  func.func @transform_2(%arg0: i32) -> (i32, i32) {
    %c0_i32 = arith.constant 0 : i32
    %c0_i32_0 = arith.constant 0 : i32
    %c0_i32_1 = arith.constant 0 : i32
    return %c0_i32, %c0_i32_0 : i32, i32
  }
  func.func @transform_3(%arg0: i32) -> (i32, i32) {
    %c0_i32 = arith.constant 0 : i32
    %c0_i32_0 = arith.constant 0 : i32
    %c0_i32_1 = arith.constant 0 : i32
    return %c0_i32, %c0_i32_0 : i32, i32
  }
  func.func @transform_4(%arg0: i32) -> (i32, i32) {
    %c0_i32 = arith.constant 0 : i32
    %c0_i32_0 = arith.constant 0 : i32
    return %arg0, %c0_i32 : i32, i32
  }
}

</mosaic_0001>

<bundles_post_ra>
// kernel: dqn_forward.1
= control target key start
LH: loop header
LB: loop body
LE: loop exit
PB: predicated region body
PF: predicated region fallthrough
CT: control target
= control target key end

     0   :  { %vm26_vm0 = vcmask 1040384   ;;  %v434_v1 = vmov 0.0   ;;  %vm435_vm1 = vmmov 0   ;;  %vm22_vm2 = vcmask 138240   ;;  %s614_s0 = inlined_call_operand.vmem [shape: f32[8,17], index: 0, kind: input, shape index: {}]   ;;  %s615_s1 = inlined_call_operand.vmem [shape: f32[17,128], index: 1, kind: input, shape index: {}]   ;;  %s616_s2 = inlined_call_operand.vmem [shape: f32[128,128], index: 2, kind: input, shape index: {}]   ;;  %s617_s3 = inlined_call_operand.vmem [shape: f32[128,8], index: 3, kind: input, shape index: {}]   ;;  %s618_s4 = inlined_call_operand.hbm [shape: f32[8,8], index: 4, kind: output, shape index: {}]  }
   0x1   :  { %v21_v0 = vld [vmem:[%s615_s1 + $0x10] sm:$0x1]  ;;  %330 = vmatprep.subr.mxu0 %v434_v1  ;;  %v20_v2 = vld [vmem:[%s615_s1 + $0x8] sm:$0xff]  ;;  %339 = vmatprep.subr.mxu1 %v434_v1  ;;  %v116_v3 = vld [vmem:[%s616_s2 + $0x78] sm:$0xff] }
   0x2   :  { %331 = vmatpush3.msk.msra.mxu0 %vm26_vm0, %v21_v0  ;;  %336 = vmatprep.mubr.msk.f32.mxu0 %vm435_vm1, %v434_v1  ;;  %v115_v4 = vld [vmem:[%s616_s2 + $0x70] sm:$0xff]  ;;  %v19_v5 = vld [vmem:[%s615_s1] sm:$0xff]  ;;  %v114_v7 = vld [vmem:[%s616_s2 + $0x68] sm:$0xff] }
   0x3   :  { %332 = vmatprep.subr.mxu0 %v434_v1  ;;  %340 = vmatpush3.msra.mxu1 %v116_v3  ;;  %v18_v6 = vld [vmem:[%s614_s0] sm:$0xff] }
   0x4   :  { %333 = vmatpush3.msra.mxu0 %v20_v2  ;;  %341 = vmatprep.subr.mxu1 %v434_v1  ;;  %v113_v8 = vld [vmem:[%s616_s2 + $0x60] sm:$0xff] }
   0x5   :  { %334 = vmatprep.subr.mxu0 %v434_v1  ;;  %342 = vmatpush3.msra.mxu1 %v115_v4 }
   0x6   :  { %335 = vmatpush3.msra.mxu0 %v19_v5  ;;  %343 = vmatprep.subr.mxu1 %v434_v1 }
   0x7   :  { %9 = vsyncpa [#allocation3], 0  ;;  %337 = vmatmul.mubr.msk.f32.vlgmr.msra.gmra.mxu0 %vm22_vm2, %v18_v6  ;;  %344 = vmatpush3.msra.mxu1 %v114_v7  ;;  %v112_v9 = vld [vmem:[%s616_s2 + $0x58] sm:$0xff]  ;;  %v111_v10 = vld [vmem:[%s616_s2 + $0x50] sm:$0xff]  ;;  %s436_s29 = smov [#allocation2]   ;;  %vm274_vm3 = vcmask 64512  }
   0x8   :  { %345 = vmatprep.subr.mxu1 %v434_v1  ;;  %371 = vmatprep.mubr.msk.f32.mxu1 %vm435_vm1, %v434_v1  ;;  %v110_v11 = vld [vmem:[%s616_s2 + $0x48] sm:$0xff]  ;;  %v109_v12 = vld [vmem:[%s616_s2 + $0x40] sm:$0xff]  ;;  %v108_v13 = vld [vmem:[%s616_s2 + $0x38] sm:$0xff]  ;;  %s282_s0 = sshll.u32 %s436_s29, 4  ;;  %s283_s0 = int_to_ptr.vmem [resolvable:$true] %s282_s0 }
   0x9   :  { %346 = vmatpush3.msra.mxu1 %v113_v8  ;;  %374 = vmatprep.subr.mxu0 %v434_v1  ;;  %v107_v14 = vld [vmem:[%s616_s2 + $0x30] sm:$0xff]  ;;  %v106_v15 = vld [vmem:[%s616_s2 + $0x28] sm:$0xff]  ;;  %v105_v16 = vld [vmem:[%s616_s2 + $0x20] sm:$0xff]  ;;  %s412_s30 = scalar_lea.vmem %s283_s0, 128  ;;  %p417_p1 = scmp.lt.s32.totalorder %s283_s0, %s283_s0 }
   0xa   :  { %347 = vmatprep.subr.mxu1 %v434_v1  ;;  %406 = vmatprep.mubr.msk.f32.mxu0 %vm435_vm1, %v434_v1  ;;  %v104_v17 = vld [vmem:[%s616_s2 + $0x18] sm:$0xff]  ;;  %v103_v18 = vld [vmem:[%s616_s2 + $0x10] sm:$0xff]  ;;  %v102_v19 = vld [vmem:[%s616_s2 + $0x8] sm:$0xff]  ;;  %p413_p0 = scmp.ne.s32.totalorder %s283_s0, %s412_s30  ;;  %p418_p2 = scmp.lt.s32.totalorder %s412_s30, %s412_s30 }
   0xb   :  { %348 = vmatpush3.msra.mxu1 %v112_v9  ;;  %v101_v20 = vld [vmem:[%s616_s2] sm:$0xff]  ;;  %v203_v21 = vld [vmem:[%s617_s3 + $0x78] sm:$0xff]  ;;  %v202_v22 = vld [vmem:[%s617_s3 + $0x70] sm:$0xff] }
   0xc   :  { %349 = vmatprep.subr.mxu1 %v434_v1  ;;  %375 = vmatpush3.msra.mxu0 %v203_v21  ;;  %v201_v23 = vld [vmem:[%s617_s3 + $0x68] sm:$0xff]  ;;  %v200_v24 = vld [vmem:[%s617_s3 + $0x60] sm:$0xff]  ;;  %v199_v25 = vld [vmem:[%s617_s3 + $0x58] sm:$0xff]  ;;  %p419_p3 = por %p418_p2, %p417_p1 }
   0xd   :  { %350 = vmatpush3.msra.mxu1 %v111_v10  ;;  %376 = vmatprep.subr.mxu0 %v434_v1  ;;  %v198_v26 = vld [vmem:[%s617_s3 + $0x50] sm:$0xff]  ;;  %v197_v27 = vld [vmem:[%s617_s3 + $0x48] sm:$0xff]  ;;  %v196_v28 = vld [vmem:[%s617_s3 + $0x40] sm:$0xff] }
   0xe   :  { %351 = vmatprep.subr.mxu1 %v434_v1  ;;  %377 = vmatpush3.msra.mxu0 %v202_v22  ;;  %v195_v29 = vld [vmem:[%s617_s3 + $0x38] sm:$0xff]  ;;  %v194_v30 = vld [vmem:[%s617_s3 + $0x30] sm:$0xff]  ;;  %v193_v31 = vld [vmem:[%s617_s3 + $0x28] sm:$0xff]  ;;  %p420_p4 = pnand %p419_p3, %p413_p0 }
   0xf   :  { %352 = vmatpush3.msra.mxu1 %v110_v11  ;;  %378 = vmatprep.subr.mxu0 %v434_v1  ;;  %v192_v32 = vld [vmem:[%s617_s3 + $0x20] sm:$0xff]  ;;  %v191_v33 = vld [vmem:[%s617_s3 + $0x18] sm:$0xff]  ;;  %v190_v34 = vld [vmem:[%s617_s3 + $0x10] sm:$0xff] }
  0x10   :  { %353 = vmatprep.subr.mxu1 %v434_v1  ;;  %379 = vmatpush3.msra.mxu0 %v201_v23  ;;  %v189_v38 = vld [vmem:[%s617_s3 + $0x8] sm:$0xff]  ;;  %v188_v39 = vld [vmem:[%s617_s3] sm:$0xff] }
  0x11   :  { %354 = vmatpush3.msra.mxu1 %v109_v12  ;;  %380 = vmatprep.subr.mxu0 %v434_v1 }
  0x12   :  { %355 = vmatprep.subr.mxu1 %v434_v1  ;;  %381 = vmatpush3.msra.mxu0 %v200_v24 }
  0x13   :  { %356 = vmatpush3.msra.mxu1 %v108_v13  ;;  %382 = vmatprep.subr.mxu0 %v434_v1 }
  0x14   :  { %357 = vmatprep.subr.mxu1 %v434_v1  ;;  %383 = vmatpush3.msra.mxu0 %v199_v25 }
  0x15   :  { %358 = vmatpush3.msra.mxu1 %v107_v14  ;;  %384 = vmatprep.subr.mxu0 %v434_v1 }
  0x16   :  { %359 = vmatprep.subr.mxu1 %v434_v1  ;;  %385 = vmatpush3.msra.mxu0 %v198_v26 }
  0x17   :  { %360 = vmatpush3.msra.mxu1 %v106_v15  ;;  %386 = vmatprep.subr.mxu0 %v434_v1 }
  0x18   :  { %361 = vmatprep.subr.mxu1 %v434_v1  ;;  %387 = vmatpush3.msra.mxu0 %v197_v27 }
  0x19   :  { %362 = vmatpush3.msra.mxu1 %v105_v16  ;;  %388 = vmatprep.subr.mxu0 %v434_v1 }
  0x1a   :  { %363 = vmatprep.subr.mxu1 %v434_v1  ;;  %389 = vmatpush3.msra.mxu0 %v196_v28 }
  0x1b   :  { %364 = vmatpush3.msra.mxu1 %v104_v17  ;;  %390 = vmatprep.subr.mxu0 %v434_v1 }
  0x1c   :  { %365 = vmatprep.subr.mxu1 %v434_v1  ;;  %391 = vmatpush3.msra.mxu0 %v195_v29 }
  0x1d   :  { %366 = vmatpush3.msra.mxu1 %v103_v18  ;;  %392 = vmatprep.subr.mxu0 %v434_v1 }
  0x1e   :  { %367 = vmatprep.subr.mxu1 %v434_v1  ;;  %393 = vmatpush3.msra.mxu0 %v194_v30 }
  0x1f   :  { %368 = vmatpush3.msra.mxu1 %v102_v19  ;;  %394 = vmatprep.subr.mxu0 %v434_v1 }
  0x20   :  { %369 = vmatprep.subr.mxu1 %v434_v1  ;;  %395 = vmatpush3.msra.mxu0 %v193_v31 }
  0x21   :  { %370 = vmatpush3.msra.mxu1 %v101_v20  ;;  %396 = vmatprep.subr.mxu0 %v434_v1 }
  0x22   :  { %397 = vmatpush3.msra.mxu0 %v192_v32 }
  0x23   :  { %398 = vmatprep.subr.mxu0 %v434_v1 }
  0x24   :  { %399 = vmatpush3.msra.mxu0 %v191_v33 }
  0x25   :  { %400 = vmatprep.subr.mxu0 %v434_v1 }
  0x26   :  { %401 = vmatpush3.msra.mxu0 %v190_v34 }
  0x27   :  { %402 = vmatprep.subr.mxu0 %v434_v1 }
  0x28   :  { %403 = vmatpush3.msra.mxu0 %v189_v38 }
  0x29   :  { %404 = vmatprep.subr.mxu0 %v434_v1 }
  0x2a   :  { %405 = vmatpush3.msra.mxu0 %v188_v39 }
  0xc7   :  { %v96_v35 = vpop.f32.mrf.mxu0 }
  0xc8   :  { %v100_v36 = vmax.f32 %v96_v35, 0.0 }
  0xc9   :  { %v338_v37 = vpop.f32.mrf.mxu0 }
  0xca   :  { %372 = vmatmul.mubr.f32.vlgmr.msra.gmra.mxu1 %v100_v36 }
 0x18a   :  { %v183_v40 = vpop.f32.mrf.mxu1 }
 0x18b   :  { %v187_v41 = vmax.f32 %v183_v40, 0.0 }
 0x18c   :  { %v373_v42 = vpop.f32.mrf.mxu1 }
 0x18d   :  { %407 = vmatmul.mubr.f32.vlgmr.msra.gmra.mxu0 %v187_v41 }
 0x24d   :  { %v270_v43 = vpop.f32.mrf.mxu0 }
 0x24e   :  { %275 = vst.msk [vmem:[#allocation2] sm:$0xff] %vm274_vm3, %v270_v43 }
 0x24f   :  { %v408_v44 = vpop.f32.mrf.mxu0 }
 0x250   :  { %423 = shalt.err (!%p420_p4)
}
 0x251   :  { %285 = dma.vmem_to_hbm [thread:$0]  %s283_s0, 128, %s618_s4, [#allocation3]  }
 0x252   :  { %432 = dma.done.wait [#allocation3], 128  }
 0x253   :  { %433 = vsyncadd [#allocation3], 4294967168 }
 0x254   :  { %289 = vsyncpa [#allocation3], 1 }

</bundles_post_ra>
